<compile_context>
chip_gen: v7x
topology: tpu7x:2x2x1
jax: 0.10.0
libtpu: 0.0.40
codegen_flags: <defaults>
</compile_context>

<pallas_src>
import jax
import jax.numpy as jnp
from jax.experimental import pallas as pl
from jax.experimental.pallas import tpu as pltpu


def mlp_kernel(x_ref, w_ref, b_ref, o_ref):
    # x_ref: (TM, D) VMEM   w_ref: (1, D) VMEM   b_ref: (1,) SMEM   o_ref: (1, TM) VMEM
    # y[0, m] = sum_d w[0, d] * x[m, d]  -> lane-dense (1, TM) result.
    # lhs (1, D) is in native orientation (K in lanes); x enters as the
    # transposed-RHS operand of the MXU.
    # TODO(synk): dump pl.lower_as_mlir on the target gen and confirm no
    # full-tile vxpose of x is emitted; if it is, switch to the VPU path
    # (jnp.sum(x_ref[...] * w_ref[...], axis=-1) + small (TM,)->(1,TM) relayout).
    y = jax.lax.dot_general(
        w_ref[...],
        x_ref[...],
        dimension_numbers=(((1,), (1,)), ((), ())),
        preferred_element_type=jnp.float32,
    )
    y = y + b_ref[0]
    o_ref[...] = jax.nn.sigmoid(y).astype(o_ref.dtype)


_TM_CAP = 32768  # 4 MiB f32 x tile at D=32 -- well past the ~85%-of-roofline knee.


def _vmem_capacity_bytes():
    """Physical VMEM of the current chip; conservative fallback if unknown."""
    try:
        cap = getattr(pltpu.get_tpu_info(), "vmem_capacity_bytes", None)
        if cap:
            return int(cap)
    except Exception:
        pass
    return 64 * 1024 * 1024  # v7x per-core physical VMEM (most restrictive gen)


def _choose_tm(batch, d, itemsize, vmem_cap_bytes):
    """Batch tile: 128-aligned (lane-dense output), big, VMEM-safe on all gens."""
    # ~1/3 of physical VMEM goes to the two in-flight x tiles; the rest covers
    # the double-buffered (1, TM) output slabs, weight, spills and scratch.
    budget = max(2 << 20, vmem_cap_bytes // 3)
    rows = budget // max(1, 2 * d * itemsize)
    tm_cap = min(_TM_CAP, max(128, (rows // 128) * 128))
    batch_up = -(-batch // 128) * 128  # 128-aligned => unmasked output stores
    tm = min(tm_cap, batch_up)
    # Prefer >= 2 grid tiles when the batch allows it so the "parallel" axis can
    # feed both TensorCores on v7x (one extra ~0.35 us step elsewhere: noise).
    if batch_up >= 256 and pl.cdiv(batch, tm) < 2:
        tm = max(128, (-(-(batch_up // 2) // 128)) * 128)
    return tm


def mlp_forward(x, w, b, *, tm=None):
    """sigmoid(x @ w + b).  x: (B, D), w: (D, 1) or (D,), b: (1,) or ().  -> (B, 1)."""
    B, D = x.shape
    dtype = x.dtype
    itemsize = jnp.dtype(dtype).itemsize
    w_row = jnp.asarray(w, dtype).reshape(1, D)  # lane-dense weight layout
    b_vec = jnp.asarray(b, dtype).reshape(1)     # scalar bias -> SMEM

    cap = _vmem_capacity_bytes()
    if tm is None:
        tm = _choose_tm(B, D, itemsize, cap)
    n_tiles = pl.cdiv(B, tm)

    # Scoped-VMEM limit sized to what this kernel actually needs (+ headroom),
    # clamped below physical VMEM so the same code runs on v5e/v6e/v7x.
    need = (2 * tm * D * itemsize          # double-buffered x tiles
            + 2 * 8 * tm * 4               # double-buffered (1, TM) output slabs (8-sublane padded)
            + 8 * max(128, D) * itemsize)  # resident weight
    vmem_limit = int(min(cap * 9 // 10, max(16 << 20, need + (12 << 20))))

    out = pl.pallas_call(
        mlp_kernel,
        out_shape=jax.ShapeDtypeStruct((1, B), dtype),
        grid_spec=pltpu.PrefetchScalarGridSpec(
            num_scalar_prefetch=0,
            grid=(n_tiles,),
            in_specs=[
                pl.BlockSpec((tm, D), lambda i: (i, 0)),              # streamed x tiles
                pl.BlockSpec((1, D), lambda i: (0, 0)),               # resident weight
                pl.BlockSpec(memory_space=pltpu.MemorySpace.SMEM),    # scalar bias
            ],
            out_specs=pl.BlockSpec((1, tm), lambda i: (0, i)),        # lane-dense output
        ),
        compiler_params=pltpu.CompilerParams(
            dimension_semantics=("parallel",),  # batch tiles shard across TCs on v7x
            vmem_limit_bytes=vmem_limit,
        ),
    )(x, w_row, b_vec)

    return out.reshape(B, 1)


if __name__ == "__main__":
    key = jax.random.PRNGKey(0)
    kx, kw, kb, kx2, kx3 = jax.random.split(key, 5)

    # Small shapes consistent with the module: batch=8, n_inputs=32.
    B, D = 8, 32
    x = jax.random.normal(kx, (B, D), dtype=jnp.float32)

    # Deterministic param init mimicking torch.nn.Linear: U(-1/sqrt(D), 1/sqrt(D))
    bound = 1.0 / (D ** 0.5)
    w = jax.random.uniform(kw, (D, 1), minval=-bound, maxval=bound, dtype=jnp.float32)
    b = jax.random.uniform(kb, (1,), minval=-bound, maxval=bound, dtype=jnp.float32)

    out = mlp_forward(x, w, b)
    jax.block_until_ready(out)
    ref = jax.nn.sigmoid(x @ w + b)
    assert out.shape == (B, 1)
    assert jnp.allclose(out, ref, atol=1e-5, rtol=1e-5), "mismatch vs reference"

    # Ragged batch, forced small TM -> 3 tiles with a partial last block (no jnp.pad).
    B2 = 300
    x2 = jax.random.normal(kx2, (B2, D), dtype=jnp.float32)
    out2 = mlp_forward(x2, w, b, tm=128)
    jax.block_until_ready(out2)
    ref2 = jax.nn.sigmoid(x2 @ w + b)
    assert out2.shape == (B2, 1)
    assert jnp.allclose(out2, ref2, atol=1e-5, rtol=1e-5), "mismatch vs reference (tiled)"

    # Auto tile choice: exercises the >=2-tile split path (keeps both v7x TCs busy).
    B3 = 1000
    x3 = jax.random.normal(kx3, (B3, D), dtype=jnp.float32)
    out3 = mlp_forward(x3, w, b)
    jax.block_until_ready(out3)
    ref3 = jax.nn.sigmoid(x3 @ w + b)
    assert out3.shape == (B3, 1)
    assert jnp.allclose(out3, ref3, atol=1e-5, rtol=1e-5), "mismatch vs reference (auto)"

    print("KERNEL_OK")
</pallas_src>

<mosaic_0001>
module attributes {stable_mosaic.version = 11 : i64} {
  func.func @mlp_kernel(%arg0: i32, %arg1: memref<128x32xf32, #tpu.memory_space<vmem>>, %arg2: memref<1x32xf32, #tpu.memory_space<vmem>>, %arg3: memref<1xf32, #tpu.memory_space<smem>>, %arg4: memref<1x128xf32, #tpu.memory_space<vmem>>) attributes {dimension_semantics = [#tpu.dimension_semantics<parallel>], iteration_bounds = array<i64: 1>, scalar_prefetch = 0 : i64, scratch_operands = 0 : i64, tpu.core_type = #tpu.core_type<tc>, window_params = [{transform_indices = @transform_0, window_bounds = array<i64: 128, 32>}, {pipeline_mode = #tpu.pipeline_mode<synchronous>, transform_indices = @transform_1, window_bounds = array<i64: 1, 32>}, {transform_indices = @transform_2, window_bounds = array<i64: 1>}, {transform_indices = @transform_3, window_bounds = array<i64: 1, 128>}]} {
    %c0 = arith.constant 0 : index
    %c0_0 = arith.constant 0 : index
    %0 = vector.load %arg2[%c0, %c0_0] : memref<1x32xf32, #tpu.memory_space<vmem>>, vector<1x32xf32>
    %c0_1 = arith.constant 0 : index
    %c0_2 = arith.constant 0 : index
    %1 = vector.load %arg1[%c0_1, %c0_2] : memref<128x32xf32, #tpu.memory_space<vmem>>, vector<128x32xf32>
    %cst = arith.constant dense<0.000000e+00> : vector<1x128xf32>
    %2 = tpu.matmul %0, %1, %cst {dimension_numbers = #tpu.dot_dimension_numbers<[1], [1], [0], [0], [0, 0, 1, 0], [], []>} : vector<1x32xf32>, vector<128x32xf32>, vector<1x128xf32> -> vector<1x128xf32>
    %c0_3 = arith.constant 0 : index
    %3 = memref.load %arg3[%c0_3] : memref<1xf32, #tpu.memory_space<smem>>
    %4 = vector.broadcast %3 : f32 to vector<1x128xf32>
    %5 = arith.addf %2, %4 : vector<1x128xf32>
    %6 = arith.negf %5 : vector<1x128xf32>
    %7 = math.exp %6 : vector<1x128xf32>
    %cst_4 = arith.constant 1.000000e+00 : f32
    %8 = vector.broadcast %cst_4 : f32 to vector<1x128xf32>
    %9 = arith.addf %8, %7 : vector<1x128xf32>
    %10 = arith.divf %8, %9 : vector<1x128xf32>
    %c0_5 = arith.constant 0 : index
    %c0_6 = arith.constant 0 : index
    %11 = vector.load %arg4[%c0_5, %c0_6] : memref<1x128xf32, #tpu.memory_space<vmem>>, vector<1x128xf32>
    tpu.vector_store %arg4[%c0_5, %c0_6], %10 {strides = array<i32>} : memref<1x128xf32, #tpu.memory_space<vmem>>, vector<1x128xf32>,
    return
  }
  func.func @transform_0(%arg0: i32) -> (i32, i32) {
    %c0_i32 = arith.constant 0 : i32
    %c0_i32_0 = arith.constant 0 : i32
    return %arg0, %c0_i32 : i32, i32
  }
  func.func @transform_1(%arg0: i32) -> (i32, i32) {
    %c0_i32 = arith.constant 0 : i32
    %c0_i32_0 = arith.constant 0 : i32
    %c0_i32_1 = arith.constant 0 : i32
    return %c0_i32, %c0_i32_0 : i32, i32
  }
  func.func @transform_2(%arg0: i32) -> i32 {
    %c0_i32 = arith.constant 0 : i32
    %c0_i32_0 = arith.constant 0 : i32
    return %c0_i32 : i32
  }
  func.func @transform_3(%arg0: i32) -> (i32, i32) {
    %c0_i32 = arith.constant 0 : i32
    %c0_i32_0 = arith.constant 0 : i32
    return %c0_i32, %arg0 : i32, i32
  }
}

</mosaic_0001>

<bundles_post_ra>
// kernel: tpu_custom_call.1
= control target key start
LH: loop header
LB: loop body
LE: loop exit
PB: predicated region body
PF: predicated region fallthrough
CT: control target
= control target key end

     0   :  { %9 = vsyncpa [#allocation4], 0  ;;  %s434_s0 = inlined_call_operand.hbm [shape: f32[8,32], index: 0, kind: input, shape index: {}]   ;;  %s435_s1 = inlined_call_operand.vmem [shape: f32[1,32], index: 1, kind: input, shape index: {}]   ;;  %s436_s2 = inlined_call_operand.<no memory space> [shape: f32[1], index: 2, kind: input, shape index: {}]   ;;  %s437_s3 = inlined_call_operand.hbm [shape: f32[1,8], index: 3, kind: output, shape index: {}]  }
   0x1   :  { %10 = vsyncpa [#allocation5], 0 }
   0x2   :  { %15 = vsyncadd [#allocation4], 1920  ;;  %s354_s12 = smov [#allocation3]   ;;  %s306_s16 = scalar_lea.hbm %s434_s0, 128 }
   0x3   :  { %s16_s13 = sshll.u32 %s354_s12, 4  ;;  %p307_p0 = scmp.ne.s32.totalorder %s434_s0, %s306_s16  ;;  %s17_s13 = int_to_ptr.vmem [resolvable:$true] %s16_s13 }
   0x4   :  { %p310_p1 = scmp.lt.u32.totalorder %s306_s16, %s434_s0 }
   0x6   :  { %p312_p2 = pnand %p310_p1, %p307_p0 }
   0x8   :  { %315 = shalt.err (!%p312_p2)
}
   0x9   :  { %s316_s21 = scalar_lea.vmem %s17_s13, 128  ;;  %s320_s22 = scalar_lea.vmem %s17_s13, 2048 }
   0xa   :  { %p317_p3 = scmp.ne.s32.totalorder %s17_s13, %s316_s21  ;;  %p321_p4 = scmp.lt.s32.totalorder %s17_s13, %s17_s13 }
   0xb   :  { %p322_p5 = scmp.lt.s32.totalorder %s320_s22, %s316_s21 }
   0xd   :  { %p323_p6 = por %p322_p5, %p321_p4 }
   0xf   :  { %p324_p7 = pnand %p323_p6, %p317_p3 }
  0x11   :  { %327 = shalt.err (!%p324_p7)
}
  0x12   :  { %s355_s23 = smov 128   ;;  %s356_s24 = smov 8  }
  0x13   :  { %22 = dma.hbm_to_vmem [thread:$0]  %s434_s0, 128, %s17_s13, [#allocation4], %s355_s23, %s355_s23, %s356_s24  }
  0x14   :  { %350 = dma.done.wait [#allocation4], 2048  }
  0x15   :  { %351 = vsyncadd [#allocation4], 4294965248  ;;  %v357_v0 = vmov 0.0|0.0   ;;  %vm358_vm0 = vmmov 0   ;;  %v359_v1 = vmov 0.0   ;;  %vm49_vm1 = vcmask 261120  }
  0x16   :  { %263 = vmatprep.subr.bf16.mxu0 %v357_v0  ;;  %260 = vmatprep.mubr.msk.f32.mxu0 %vm358_vm0, %v359_v1  ;;  %v31_v2 = vld [vmem:[#allocation3] sm:$0xff]  ;;  %v32_v3 = vld [vmem:[#allocation3 + $0x8] sm:$0xff]  ;;  %vm395_vm2 = vmpackc.low %vm49_vm1, %vm49_vm1  ;;  %v48_v28 = vstv %s436_s2  ;;  %s360_s30 = smov [#allocation6]  }
  0x17   :  { %v264_v5 = vpack.c.bf16 %v32_v3, %v31_v2  ;;  %v33_v6 = vld [vmem:[#allocation3 + $0x10] sm:$0xff]  ;;  %v34_v7 = vld [vmem:[#allocation3 + $0x18] sm:$0xff]  ;;  %v35_v9 = vld [vmem:[#allocation3 + $0x20] sm:$0xff]  ;;  %s184_s4 = sshll.u32 %s360_s30, 4  ;;  %s185_s4 = int_to_ptr.vmem [resolvable:$true] %s184_s4 }
  0x18   :  { %v268_v8 = vpack.c.bf16 %v34_v7, %v33_v6  ;;  %v36_v10 = vld [vmem:[#allocation3 + $0x28] sm:$0xff]  ;;  %v37_v12 = vld [vmem:[#allocation3 + $0x30] sm:$0xff]  ;;  %v38_v13 = vld [vmem:[#allocation3 + $0x38] sm:$0xff]  ;;  %s332_s5 = scalar_lea.vmem %s185_s4, 32  ;;  %p333_p9 = scmp.lt.s32.totalorder %s185_s4, %s185_s4 }
  0x19   :  { %266 = vmatpush3.bf16.xpose.msk.msra.mxu0 %vm395_vm2, %v264_v5  ;;  %v272_v11 = vpack.c.bf16 %v36_v10, %v35_v9  ;;  %v276_v14 = vpack.c.bf16 %v38_v13, %v37_v12  ;;  %v39_v15 = vld [vmem:[#allocation3 + $0x40] sm:$0xff]  ;;  %v40_v16 = vld [vmem:[#allocation3 + $0x48] sm:$0xff]  ;;  %v41_v18 = vld [vmem:[#allocation3 + $0x50] sm:$0xff] }
  0x1a   :  { %267 = vmatprep.subr.bf16.mxu0 %v357_v0  ;;  %v280_v17 = vpack.c.bf16 %v40_v16, %v39_v15  ;;  %v42_v19 = vld [vmem:[#allocation3 + $0x58] sm:$0xff]  ;;  %v43_v21 = vld [vmem:[#allocation3 + $0x60] sm:$0xff]  ;;  %v44_v22 = vld [vmem:[#allocation3 + $0x68] sm:$0xff] }
  0x1b   :  { %v284_v20 = vpack.c.bf16 %v42_v19, %v41_v18  ;;  %v288_v23 = vpack.c.bf16 %v44_v22, %v43_v21  ;;  %v45_v24 = vld [vmem:[#allocation3 + $0x70] sm:$0xff]  ;;  %v46_v25 = vld [vmem:[#allocation3 + $0x78] sm:$0xff]  ;;  %v30_v27 = vld [vmem:[%s435_s1] sm:$0x1]  ;;  %s328_s1 = scalar_lea.vmem %s185_s4, 16 }
  0x1c   :  { %v292_v26 = vpack.c.bf16 %v46_v25, %v45_v24  ;;  %p329_p8 = scmp.ne.s32.totalorder %s185_s4, %s328_s1  ;;  %p334_p10 = scmp.lt.s32.totalorder %s332_s5, %s328_s1 }
  0x1e   :  { %p335_p11 = por %p334_p10, %p333_p9 }
  0x20   :  { %p336_p12 = pnand %p335_p11, %p329_p8 }
  0x21   :  { %270 = vmatpush3.bf16.xpose.msk.msra.mxu0 %vm395_vm2, %v268_v8 }
  0x22   :  { %271 = vmatprep.subr.bf16.mxu0 %v357_v0 }
  0x29   :  { %274 = vmatpush3.bf16.xpose.msk.msra.mxu0 %vm395_vm2, %v272_v11 }
  0x2a   :  { %275 = vmatprep.subr.bf16.mxu0 %v357_v0 }
  0x31   :  { %278 = vmatpush3.bf16.xpose.msk.msra.mxu0 %vm395_vm2, %v276_v14 }
  0x32   :  { %279 = vmatprep.subr.bf16.mxu0 %v357_v0 }
  0x39   :  { %282 = vmatpush3.bf16.xpose.msk.msra.mxu0 %vm395_vm2, %v280_v17 }
  0x3a   :  { %283 = vmatprep.subr.bf16.mxu0 %v357_v0 }
  0x41   :  { %286 = vmatpush3.bf16.xpose.msk.msra.mxu0 %vm395_vm2, %v284_v20 }
  0x42   :  { %287 = vmatprep.subr.bf16.mxu0 %v357_v0 }
  0x49   :  { %290 = vmatpush3.bf16.xpose.msk.msra.mxu0 %vm395_vm2, %v288_v23 }
  0x4a   :  { %291 = vmatprep.subr.bf16.mxu0 %v357_v0 }
  0x51   :  { %294 = vmatpush3.bf16.xpose.msk.msra.mxu0 %vm395_vm2, %v292_v26 }
  0x58   :  { %261 = vmatmul.mubr.msk.f32.vlgmr.msra.gmra.mrb[0].mxu0 %vm49_vm1, %v30_v27 }
 0x12b   :  { %v167_v29 = vpop.f32.mrb[0].mxu0 }
 0x12c   :  { %v168_v30 = vadd.f32 %v167_v29, %v48_v28  ;;  %v262_v31 = vpop.f32.mrb[1].mxu0 }
 0x12e   :  { %v210_v32 = vmul.f32 -1.442695, %v168_v30 }
 0x130   :  { %302 = vpow2.f32 %v210_v32 }
 0x13a   :  { %v303_v33 = vpop.eup %302 }
 0x13b   :  { %v174_v34 = vadd.f32 1.0, %v303_v33 }
 0x13d   :  { %304 = vrcp.f32 %v174_v34 }
 0x147   :  { %v305_v35 = vpop.eup %304 }
 0x148   :  { %177 = vst [vmem:[#allocation6] sm:$0x1] %v305_v35 }
 0x149   :  { %339 = shalt.err (!%p336_p12)
}
 0x14a   :  { %s340_s7 = scalar_lea.hbm %s437_s3, 16 }
 0x14b   :  { %p341_p13 = scmp.ne.s32.totalorder %s437_s3, %s340_s7  ;;  %p344_p0 = scmp.lt.u32.totalorder %s340_s7, %s437_s3 }
 0x14d   :  { %p346_p1 = pnand %p344_p0, %p341_p13 }
 0x14f   :  { %349 = shalt.err (!%p346_p1)
}
 0x150   :  { %187 = dma.vmem_to_hbm [thread:$0]  %s185_s4, 16, %s437_s3, [#allocation5]  }
 0x151   :  { %352 = dma.done.wait [#allocation5], 16  }
 0x152   :  { %353 = vsyncadd [#allocation5], 4294967280 }
 0x153   :  { %191 = vsyncpa [#allocation4], 1 }
 0x154   :  { %192 = vsyncpa [#allocation5], 1 }

</bundles_post_ra>
